<compile_context>
chip_gen: v6e
topology: v6e:2x2x1
jax: 0.10.0
libtpu: 0.0.40
codegen_flags: <defaults>
</compile_context>

<pallas_src>
import functools

import jax
import jax.numpy as jnp
from jax import lax
from jax.experimental import pallas as pl
from jax.experimental.pallas import tpu as pltpu


def _conv_bn_relu_kernel(pf_ref, w_ref, s_ref, b_ref, out_ref, *, Wp, L):
    # pf_ref : (Cin, TLpad) bf16   padded input tile, flattened pixels on lanes
    # w_ref  : (3, 3, Cout, Cin) bf16
    # s_ref  : (Cout, 1) f32       folded BN scale
    # b_ref  : (Cout, 1) f32       folded BN bias
    # out_ref: (Cout, L) f32       L = TH * Wp (lane-dense)
    pf = pf_ref[...]
    w = w_ref[...]

    # 3x3 conv: each tap is a contiguous lane slice of the flattened padded tile.
    acc = jnp.dot(w[0, 0], pf[:, 0:L], preferred_element_type=jnp.float32)
    for ky in range(3):
        for kx in range(3):
            if ky == 0 and kx == 0:
                continue
            off = ky * Wp + kx
            acc = acc + jnp.dot(w[ky, kx], pf[:, off:off + L],
                                preferred_element_type=jnp.float32)

    # BN (inference, folded) + ReLU, all in f32 on the VPU.
    out_ref[...] = jnp.maximum(acc * s_ref[...] + b_ref[...], 0.0).astype(out_ref.dtype)


def bilinear_upsample_align_corners(x, scale):
    # x: (N, C, H, W) -> (N, C, H*scale, W*scale); matches
    # F.interpolate(mode='bilinear', align_corners=True).
    N, C, H, W = x.shape
    Ho, Wo = H * scale, W * scale

    def src(out_size, in_size):
        if out_size == 1:
            return jnp.zeros((out_size,), jnp.float32)
        return jnp.arange(out_size, dtype=jnp.float32) * (in_size - 1) / (out_size - 1)

    ys = src(Ho, H)
    xs = src(Wo, W)
    y0 = jnp.floor(ys).astype(jnp.int32)
    y1 = jnp.minimum(y0 + 1, H - 1)
    wy = (ys - y0.astype(jnp.float32))[None, None, :, None]
    x0 = jnp.floor(xs).astype(jnp.int32)
    x1 = jnp.minimum(x0 + 1, W - 1)
    wx = (xs - x0.astype(jnp.float32))[None, None, None, :]

    gy = x[:, :, y0, :] * (1.0 - wy) + x[:, :, y1, :] * wy      # (N, C, Ho, W)
    return gy[:, :, :, x0] * (1.0 - wx) + gy[:, :, :, x1] * wx  # (N, C, Ho, Wo)


def upsample_interpolate_forward(x_nchw, params, *, scale=2, row_tile=8):
    w_hwio = params['w']                      # (3, 3, Cin, Cout)
    Cout = w_hwio.shape[-1]

    xu = bilinear_upsample_align_corners(x_nchw.astype(jnp.float32), scale)
    N, Cin, H, W = xu.shape
    Wp = W + 2

    TH = row_tile if (H % row_tile == 0) else H   # rows per grid step
    n_tiles = H // TH
    L = TH * Wp                                   # output pixels (incl. 2 wrap cols/row)
    TLpad = (TH + 2) * Wp + 2                     # +2 slack so the last tap stays in bounds

    # bf16 input halves the HBM->VMEM DMA; kernel accumulates in f32.
    xp = jnp.pad(xu.astype(jnp.bfloat16), ((0, 0), (0, 0), (1, 1), (1, 1)))

    # Row tiles with a 1-row halo on each side, flattened per (batch, tile, channel)
    # so that inside the kernel every 3x3 tap is a contiguous lane slice.
    row_idx = (jnp.arange(n_tiles) * TH)[:, None] + jnp.arange(TH + 2)[None, :]
    tiles = xp[:, :, row_idx, :]                          # (N, Cin, n_tiles, TH+2, Wp)
    tiles = jnp.transpose(tiles, (0, 2, 1, 3, 4))         # (N, n_tiles, Cin, TH+2, Wp)
    pf = tiles.reshape(N, n_tiles, Cin, (TH + 2) * Wp)
    pf = jnp.pad(pf, ((0, 0), (0, 0), (0, 0), (0, 2)))    # (N, n_tiles, Cin, TLpad)

    w_k = jnp.transpose(w_hwio, (0, 1, 3, 2)).astype(jnp.bfloat16)   # (3, 3, Cout, Cin)
    s = params['s'].reshape(Cout, 1).astype(jnp.float32)
    b = params['b'].reshape(Cout, 1).astype(jnp.float32)

    kernel = functools.partial(_conv_bn_relu_kernel, Wp=Wp, L=L)
    full4 = lambda n, t: (0, 0, 0, 0)
    full2 = lambda n, t: (0, 0)

    out_wide = pl.pallas_call(
        kernel,
        out_shape=jax.ShapeDtypeStruct((N, n_tiles, Cout, L), jnp.float32),
        grid_spec=pltpu.PrefetchScalarGridSpec(
            num_scalar_prefetch=0,
            grid=(N, n_tiles),
            in_specs=[
                pl.BlockSpec((None, None, Cin, TLpad), lambda n, t: (n, t, 0, 0)),
                pl.BlockSpec((3, 3, Cout, Cin), full4),
                pl.BlockSpec((Cout, 1), full2),   # folded BN scale
                pl.BlockSpec((Cout, 1), full2),   # folded BN bias
            ],
            out_specs=pl.BlockSpec((None, None, Cout, L), lambda n, t: (n, t, 0, 0)),
        ),
        compiler_params=pltpu.CompilerParams(
            dimension_semantics=("parallel", "parallel"),
            vmem_limit_bytes=32 * 1024 * 1024),
    )(pf, w_k, s, b)

    # (N, n_tiles, Cout, TH, Wp) -> NCHW; the 2 wrap columns per row are dropped here.
    out = out_wide.reshape(N, n_tiles, Cout, TH, Wp)
    out = jnp.transpose(out, (0, 2, 1, 3, 4)).reshape(N, Cout, H, Wp)
    return out[:, :, :, :W]


def reference_forward(x_nchw, params, *, scale=2):
    # Pure-JAX (XLA conv) reference for the correctness check.
    xu = bilinear_upsample_align_corners(x_nchw.astype(jnp.float32), scale)
    y = lax.conv_general_dilated(
        xu, params['w'], (1, 1), [(1, 1), (1, 1)],
        dimension_numbers=('NCHW', 'HWIO', 'NCHW'))
    y = y * params['s'][None, :, None, None] + params['b'][None, :, None, None]
    return jnp.maximum(y, 0.0)


def init_params(dim_in, dim_out, key):
    w = 0.1 * jax.random.normal(key, (3, 3, dim_in, dim_out), jnp.float32)  # HWIO
    c = jnp.arange(dim_out, dtype=jnp.float32)
    gamma = 1.0 + 0.05 * c
    beta = 0.02 * c
    mean = 0.03 * c
    var = 1.0 + 0.04 * c
    scale = gamma / jnp.sqrt(var + 1e-5)
    bias = beta - mean * scale
    return dict(w=w, s=scale, b=bias)


if __name__ == "__main__":
    key = jax.random.PRNGKey(0)
    kx, kp = jax.random.split(key)
    dim_in, dim_out = 4, 8
    x = jax.random.normal(kx, (2, dim_in, 16, 16), jnp.float32)   # NCHW

    params = init_params(dim_in, dim_out, kp)

    fwd = jax.jit(functools.partial(upsample_interpolate_forward, scale=2, row_tile=8))
    out = jax.block_until_ready(fwd(x, params))

    ref = reference_forward(x, params, scale=2)
    assert out.shape == ref.shape == (2, dim_out, 32, 32)
    # Tolerance accounts for bf16 MXU operands (inputs/weights rounded to bf16).
    if not jnp.allclose(out, ref, atol=2e-2, rtol=2e-2):
        max_err = float(jnp.max(jnp.abs(out - ref)))
        raise AssertionError(f"mismatch vs reference, max abs err={max_err}")

    print("KERNEL_OK")
</pallas_src>

<mosaic_0001>
module attributes {stable_mosaic.version = 11 : i64} {
  func.func @_conv_bn_relu_kernel(%arg0: i32, %arg1: i32, %arg2: memref<1x1x4x342xbf16, #tpu.memory_space<vmem>>, %arg3: memref<3x3x8x4xbf16, #tpu.memory_space<vmem>>, %arg4: memref<8x1xf32, #tpu.memory_space<vmem>>, %arg5: memref<8x1xf32, #tpu.memory_space<vmem>>, %arg6: memref<1x1x8x272xf32, #tpu.memory_space<vmem>>) attributes {dimension_semantics = [#tpu.dimension_semantics<parallel>, #tpu.dimension_semantics<parallel>], iteration_bounds = array<i64: 2, 4>, scalar_prefetch = 0 : i64, scratch_operands = 0 : i64, tpu.core_type = #tpu.core_type<tc>, window_params = [{transform_indices = @transform_0, window_bounds = array<i64: 1, 1, 4, 342>}, {pipeline_mode = #tpu.pipeline_mode<synchronous>, transform_indices = @transform_1, window_bounds = array<i64: 3, 3, 8, 4>}, {pipeline_mode = #tpu.pipeline_mode<synchronous>, transform_indices = @transform_2, window_bounds = array<i64: 8, 1>}, {pipeline_mode = #tpu.pipeline_mode<synchronous>, transform_indices = @transform_3, window_bounds = array<i64: 8, 1>}, {transform_indices = @transform_4, window_bounds = array<i64: 1, 1, 8, 272>}]} {
    %c0 = arith.constant 0 : index
    %c0_0 = arith.constant 0 : index
    %c0_1 = arith.constant 0 : index
    %c0_2 = arith.constant 0 : index
    %0 = vector.load %arg2[%c0, %c0_0, %c0_1, %c0_2] : memref<1x1x4x342xbf16, #tpu.memory_space<vmem>>, vector<1x1x4x342xbf16>
    %1 = vector.shape_cast %0 : vector<1x1x4x342xbf16> to vector<4x342xbf16>
    %c0_3 = arith.constant 0 : index
    %c0_4 = arith.constant 0 : index
    %c0_5 = arith.constant 0 : index
    %c0_6 = arith.constant 0 : index
    %2 = vector.load %arg3[%c0_3, %c0_4, %c0_5, %c0_6] : memref<3x3x8x4xbf16, #tpu.memory_space<vmem>>, vector<3x3x8x4xbf16>
    %3 = vector.extract_strided_slice %2 {offsets = [0, 0, 0, 0], sizes = [1, 1, 8, 4], strides = [1, 1, 1, 1]} : vector<3x3x8x4xbf16> to vector<1x1x8x4xbf16>
    %4 = vector.shape_cast %3 : vector<1x1x8x4xbf16> to vector<8x4xbf16>
    %5 = vector.extract_strided_slice %1 {offsets = [0, 0], sizes = [4, 272], strides = [1, 1]} : vector<4x342xbf16> to vector<4x272xbf16>
    %cst = arith.constant dense<0.000000e+00> : vector<8x272xf32>
    %6 = tpu.matmul %4, %5, %cst {dimension_numbers = #tpu.dot_dimension_numbers<[1], [0], [0], [1], [0, 0, 1, 1], [], []>} : vector<8x4xbf16>, vector<4x272xbf16>, vector<8x272xf32> -> vector<8x272xf32>
    %7 = vector.extract_strided_slice %2 {offsets = [0, 1, 0, 0], sizes = [1, 1, 8, 4], strides = [1, 1, 1, 1]} : vector<3x3x8x4xbf16> to vector<1x1x8x4xbf16>
    %8 = vector.shape_cast %7 : vector<1x1x8x4xbf16> to vector<8x4xbf16>
    %9 = vector.extract_strided_slice %1 {offsets = [0, 1], sizes = [4, 272], strides = [1, 1]} : vector<4x342xbf16> to vector<4x272xbf16>
    %cst_7 = arith.constant dense<0.000000e+00> : vector<8x272xf32>
    %10 = tpu.matmul %8, %9, %cst_7 {dimension_numbers = #tpu.dot_dimension_numbers<[1], [0], [0], [1], [0, 0, 1, 1], [], []>} : vector<8x4xbf16>, vector<4x272xbf16>, vector<8x272xf32> -> vector<8x272xf32>
    %11 = arith.addf %6, %10 : vector<8x272xf32>
    %12 = vector.extract_strided_slice %2 {offsets = [0, 2, 0, 0], sizes = [1, 1, 8, 4], strides = [1, 1, 1, 1]} : vector<3x3x8x4xbf16> to vector<1x1x8x4xbf16>
    %13 = vector.shape_cast %12 : vector<1x1x8x4xbf16> to vector<8x4xbf16>
    %14 = vector.extract_strided_slice %1 {offsets = [0, 2], sizes = [4, 272], strides = [1, 1]} : vector<4x342xbf16> to vector<4x272xbf16>
    %cst_8 = arith.constant dense<0.000000e+00> : vector<8x272xf32>
    %15 = tpu.matmul %13, %14, %cst_8 {dimension_numbers = #tpu.dot_dimension_numbers<[1], [0], [0], [1], [0, 0, 1, 1], [], []>} : vector<8x4xbf16>, vector<4x272xbf16>, vector<8x272xf32> -> vector<8x272xf32>
    %16 = arith.addf %11, %15 : vector<8x272xf32>
    %17 = vector.extract_strided_slice %2 {offsets = [1, 0, 0, 0], sizes = [1, 1, 8, 4], strides = [1, 1, 1, 1]} : vector<3x3x8x4xbf16> to vector<1x1x8x4xbf16>
    %18 = vector.shape_cast %17 : vector<1x1x8x4xbf16> to vector<8x4xbf16>
    %19 = vector.extract_strided_slice %1 {offsets = [0, 34], sizes = [4, 272], strides = [1, 1]} : vector<4x342xbf16> to vector<4x272xbf16>
    %cst_9 = arith.constant dense<0.000000e+00> : vector<8x272xf32>
    %20 = tpu.matmul %18, %19, %cst_9 {dimension_numbers = #tpu.dot_dimension_numbers<[1], [0], [0], [1], [0, 0, 1, 1], [], []>} : vector<8x4xbf16>, vector<4x272xbf16>, vector<8x272xf32> -> vector<8x272xf32>
    %21 = arith.addf %16, %20 : vector<8x272xf32>
    %22 = vector.extract_strided_slice %2 {offsets = [1, 1, 0, 0], sizes = [1, 1, 8, 4], strides = [1, 1, 1, 1]} : vector<3x3x8x4xbf16> to vector<1x1x8x4xbf16>
    %23 = vector.shape_cast %22 : vector<1x1x8x4xbf16> to vector<8x4xbf16>
    %24 = vector.extract_strided_slice %1 {offsets = [0, 35], sizes = [4, 272], strides = [1, 1]} : vector<4x342xbf16> to vector<4x272xbf16>
    %cst_10 = arith.constant dense<0.000000e+00> : vector<8x272xf32>
    %25 = tpu.matmul %23, %24, %cst_10 {dimension_numbers = #tpu.dot_dimension_numbers<[1], [0], [0], [1], [0, 0, 1, 1], [], []>} : vector<8x4xbf16>, vector<4x272xbf16>, vector<8x272xf32> -> vector<8x272xf32>
    %26 = arith.addf %21, %25 : vector<8x272xf32>
    %27 = vector.extract_strided_slice %2 {offsets = [1, 2, 0, 0], sizes = [1, 1, 8, 4], strides = [1, 1, 1, 1]} : vector<3x3x8x4xbf16> to vector<1x1x8x4xbf16>
    %28 = vector.shape_cast %27 : vector<1x1x8x4xbf16> to vector<8x4xbf16>
    %29 = vector.extract_strided_slice %1 {offsets = [0, 36], sizes = [4, 272], strides = [1, 1]} : vector<4x342xbf16> to vector<4x272xbf16>
    %cst_11 = arith.constant dense<0.000000e+00> : vector<8x272xf32>
    %30 = tpu.matmul %28, %29, %cst_11 {dimension_numbers = #tpu.dot_dimension_numbers<[1], [0], [0], [1], [0, 0, 1, 1], [], []>} : vector<8x4xbf16>, vector<4x272xbf16>, vector<8x272xf32> -> vector<8x272xf32>
    %31 = arith.addf %26, %30 : vector<8x272xf32>
    %32 = vector.extract_strided_slice %2 {offsets = [2, 0, 0, 0], sizes = [1, 1, 8, 4], strides = [1, 1, 1, 1]} : vector<3x3x8x4xbf16> to vector<1x1x8x4xbf16>
    %33 = vector.shape_cast %32 : vector<1x1x8x4xbf16> to vector<8x4xbf16>
    %34 = vector.extract_strided_slice %1 {offsets = [0, 68], sizes = [4, 272], strides = [1, 1]} : vector<4x342xbf16> to vector<4x272xbf16>
    %cst_12 = arith.constant dense<0.000000e+00> : vector<8x272xf32>
    %35 = tpu.matmul %33, %34, %cst_12 {dimension_numbers = #tpu.dot_dimension_numbers<[1], [0], [0], [1], [0, 0, 1, 1], [], []>} : vector<8x4xbf16>, vector<4x272xbf16>, vector<8x272xf32> -> vector<8x272xf32>
    %36 = arith.addf %31, %35 : vector<8x272xf32>
    %37 = vector.extract_strided_slice %2 {offsets = [2, 1, 0, 0], sizes = [1, 1, 8, 4], strides = [1, 1, 1, 1]} : vector<3x3x8x4xbf16> to vector<1x1x8x4xbf16>
    %38 = vector.shape_cast %37 : vector<1x1x8x4xbf16> to vector<8x4xbf16>
    %39 = vector.extract_strided_slice %1 {offsets = [0, 69], sizes = [4, 272], strides = [1, 1]} : vector<4x342xbf16> to vector<4x272xbf16>
    %cst_13 = arith.constant dense<0.000000e+00> : vector<8x272xf32>
    %40 = tpu.matmul %38, %39, %cst_13 {dimension_numbers = #tpu.dot_dimension_numbers<[1], [0], [0], [1], [0, 0, 1, 1], [], []>} : vector<8x4xbf16>, vector<4x272xbf16>, vector<8x272xf32> -> vector<8x272xf32>
    %41 = arith.addf %36, %40 : vector<8x272xf32>
    %42 = vector.extract_strided_slice %2 {offsets = [2, 2, 0, 0], sizes = [1, 1, 8, 4], strides = [1, 1, 1, 1]} : vector<3x3x8x4xbf16> to vector<1x1x8x4xbf16>
    %43 = vector.shape_cast %42 : vector<1x1x8x4xbf16> to vector<8x4xbf16>
    %44 = vector.extract_strided_slice %1 {offsets = [0, 70], sizes = [4, 272], strides = [1, 1]} : vector<4x342xbf16> to vector<4x272xbf16>
    %cst_14 = arith.constant dense<0.000000e+00> : vector<8x272xf32>
    %45 = tpu.matmul %43, %44, %cst_14 {dimension_numbers = #tpu.dot_dimension_numbers<[1], [0], [0], [1], [0, 0, 1, 1], [], []>} : vector<8x4xbf16>, vector<4x272xbf16>, vector<8x272xf32> -> vector<8x272xf32>
    %46 = arith.addf %41, %45 : vector<8x272xf32>
    %c0_15 = arith.constant 0 : index
    %c0_16 = arith.constant 0 : index
    %47 = vector.load %arg4[%c0_15, %c0_16] : memref<8x1xf32, #tpu.memory_space<vmem>>, vector<8x1xf32>
    %48 = vector.broadcast %47 : vector<8x1xf32> to vector<8x272xf32>
    %49 = arith.mulf %46, %48 : vector<8x272xf32>
    %c0_17 = arith.constant 0 : index
    %c0_18 = arith.constant 0 : index
    %50 = vector.load %arg5[%c0_17, %c0_18] : memref<8x1xf32, #tpu.memory_space<vmem>>, vector<8x1xf32>
    %51 = vector.broadcast %50 : vector<8x1xf32> to vector<8x272xf32>
    %52 = arith.addf %49, %51 : vector<8x272xf32>
    %cst_19 = arith.constant 0.000000e+00 : f32
    %53 = vector.broadcast %cst_19 : f32 to vector<8x272xf32>
    %54 = arith.maximumf %52, %53 : vector<8x272xf32>
    %c0_20 = arith.constant 0 : index
    %c0_21 = arith.constant 0 : index
    %c0_22 = arith.constant 0 : index
    %c0_23 = arith.constant 0 : index
    %55 = vector.load %arg6[%c0_20, %c0_21, %c0_22, %c0_23] : memref<1x1x8x272xf32, #tpu.memory_space<vmem>>, vector<1x1x8x272xf32>
    %56 = vector.shape_cast %55 : vector<1x1x8x272xf32> to vector<8x272xf32>
    %57 = vector.shape_cast %54 : vector<8x272xf32> to vector<1x1x8x272xf32>
    tpu.vector_store %arg6[%c0_20, %c0_21, %c0_22, %c0_23], %57 {strides = array<i32>} : memref<1x1x8x272xf32, #tpu.memory_space<vmem>>, vector<1x1x8x272xf32>,
    return
  }
  func.func @transform_0(%arg0: i32, %arg1: i32) -> (i32, i32, i32, i32) {
    %c0_i32 = arith.constant 0 : i32
    %c0_i32_0 = arith.constant 0 : i32
    %c0_i32_1 = arith.constant 0 : i32
    return %arg0, %arg1, %c0_i32, %c0_i32_0 : i32, i32, i32, i32
  }
  func.func @transform_1(%arg0: i32, %arg1: i32) -> (i32, i32, i32, i32) {
    %c0_i32 = arith.constant 0 : i32
    %c0_i32_0 = arith.constant 0 : i32
    %c0_i32_1 = arith.constant 0 : i32
    %c0_i32_2 = arith.constant 0 : i32
    %c0_i32_3 = arith.constant 0 : i32
    return %c0_i32, %c0_i32_0, %c0_i32_1, %c0_i32_2 : i32, i32, i32, i32
  }
  func.func @transform_2(%arg0: i32, %arg1: i32) -> (i32, i32) {
    %c0_i32 = arith.constant 0 : i32
    %c0_i32_0 = arith.constant 0 : i32
    %c0_i32_1 = arith.constant 0 : i32
    return %c0_i32, %c0_i32_0 : i32, i32
  }
  func.func @transform_3(%arg0: i32, %arg1: i32) -> (i32, i32) {
    %c0_i32 = arith.constant 0 : i32
    %c0_i32_0 = arith.constant 0 : i32
    %c0_i32_1 = arith.constant 0 : i32
    return %c0_i32, %c0_i32_0 : i32, i32
  }
  func.func @transform_4(%arg0: i32, %arg1: i32) -> (i32, i32, i32, i32) {
    %c0_i32 = arith.constant 0 : i32
    %c0_i32_0 = arith.constant 0 : i32
    %c0_i32_1 = arith.constant 0 : i32
    return %arg0, %arg1, %c0_i32, %c0_i32_0 : i32, i32, i32, i32
  }
}

</mosaic_0001>

<bundles_post_ra>
// kernel: upsample_interpolate_forward.1
= control target key start
LH: loop header
LB: loop body
LE: loop exit
PB: predicated region body
PF: predicated region fallthrough
CT: control target
= control target key end

     0   :  { %s1556_s15 = smov 0   ;;  %s1558_s16 = smov 0   ;;  %s1729_s0 = inlined_call_operand.vmem [shape: bf16[2,4,4,342], index: 0, kind: input, shape index: {}]   ;;  %s1730_s1 = inlined_call_operand.vmem [shape: bf16[3,3,8,4], index: 1, kind: input, shape index: {}]   ;;  %s1731_s2 = inlined_call_operand.vmem [shape: f32[8,1], index: 2, kind: input, shape index: {}]   ;;  %s1732_s3 = inlined_call_operand.vmem [shape: f32[8,1], index: 3, kind: input, shape index: {}]   ;;  %s1733_s4 = inlined_call_operand.vmem [shape: f32[2,4,8,272], index: 4, kind: output, shape index: {}]  }
   0x1   :  { %s1560_s17 = smov 0   ;;  %s1562_s18 = smov 0  }
   0x2   :  { %s1564_s19 = smov 0  }
   0x3 LB: > { %s23_s20 = sadd.s32 1, %s1509_s17  ;;  %s26_s21 = sadd.s32 1, %s1513_s18  ;;  %s1517_s19 = sphi %s1564_s19, %s14_s19   ;;  %s1513_s18 = sphi %s1562_s18, %s1737_s18   ;;  %s1509_s17 = sphi %s1560_s17, %s1736_s17   ;;  %s1505_s16 = sphi %s1558_s16, %s1735_s16   ;;  %s1501_s15 = sphi %s1556_s15, %s1734_s15  }
   0x4   : > { %p24_p0 = scmp.ge.s32.totalorder %s23_s20, 4  ;;  %p1318_p1 = scmp.ge.s32.totalorder %s1517_s19, 1 }
   0x5   : > { %p182_p2 = scmp.lt.s32.totalorder %s1517_s19, 9 }
   0x6   : > { %s1739_s20 = smov (%p24_p0, %s23_s20), 0  ;;  %s1741_s21 = smov (!%p24_p0, %s26_s21), %s1513_s18 }
   0x7   : > { %p183_p3 = pnand %p1318_p1, %p182_p2  ;;  %p28_p4 = scmp.ge.s32.totalorder %s1741_s21, 2 }
   0x8   : > { %p216_p5 = scmp.lt.s32.totalorder (!%p183_p3), %s1505_s16, 1  ;;  %p218_p6 = scmp.lt.s32.totalorder (!%p183_p3), %s1501_s15, 3 }
   0x9   : > { %s1743_s21 = smov (%p28_p4, %s1741_s21), 0  ;;  %186 = sbr.rel (%p183_p3) target bundleno = 416 (0x1a0), region = 36 }
   0xa   : > { %s1523_s29 = smov (!%p183_p3), 127   ;;  %s1524_s30 = smov (!%p183_p3), 126  }
   0xb   : > { %s1525_s5 = smov (!%p183_p3), 94   ;;  %s1526_s6 = smov (!%p183_p3), 93  }
   0xc   : > { %s1527_s7 = smov (!%p183_p3), 92   ;;  %s1528_s8 = smov (!%p183_p3), 60  }
   0xd   : > { %s1529_s9 = smov (!%p183_p3), 59   ;;  %s1530_s10 = smov (!%p183_p3), 58  }
   0xe   : > { %v250_v0 = vlaneseq  ;;  %v1519_v1 = vmov 1983009808   ;;  %s1745_s16 = smov (!%p216_p5, %s1505_s16), 1  ;;  %v1520_v3 = vmov 0.0   ;;  %s1747_s15 = smov (!%p218_p6, %s1501_s15), 3  ;;  %vm1521_vm0 = vmmov 0  }
   0xf   : > { %v248_v2 = vunpack.c.l.s4 %v1519_v1  ;;  %1368 = vmatprep.subr.bf16.mxu1 %v1520_v3  ;;  %s1423_s22 = smul.u32 12, %s1745_s16  ;;  %1370 = vmatprep.mubr.msk.bf16.mxu1 %vm1521_vm0, %v1520_v3  ;;  %v1522_v7 = vmov 0   ;;  %v1194_v13 = vld [vmem:[%s1731_s2] sm:$0xff]  ;;  %vm275_vm1 = vcmask 1041408   ;;  %vm268_vm2 = vcmask 1039360  }
  0x10   : > { %v251_v5 = vshrl.u32 %v250_v0, 7  ;;  %s1422_s23 = smul.u32 3, %s1747_s15  ;;  %317 = vmatprep.mubr.bf16.mxu0 %v1522_v7  ;;  %1476 = vset.pattern.permute.xlu0 %v1522_v7  ;;  %v1203_v14 = vld [vmem:[%s1732_s3] sm:$0xff]  ;;  %vm271_vm3 = vcmask 31744   ;;  %vm465_vm4 = vcmask 1031168   ;;  %vm570_vm5 = vcmask 769024  }
  0x11   : > { %v249_v4 = vunpack.c.0.s8 %v248_v2  ;;  %1477 = vset.pattern.permute.xlu1 %v1522_v7  ;;  %v237_v19 = vld [vmem:[%s1730_s1 + $0x4] sm:$0xf]  ;;  %v236_v29 = vld [vmem:[%s1730_s1] sm:$0xf]  ;;  %v238_v38 = vld [vmem:[%s1730_s1 + $0x8] sm:$0xf] }
  0x12   : > { %s1589_s24 = sadd.s32 %s1423_s22, %s1422_s23  ;;  %vm675_vm6 = vcmask 760832   ;;  %v239_v47 = vld [vmem:[%s1730_s1 + $0xc] sm:$0xf]  ;;  %vm780_vm7 = vcmask 752640   ;;  %v240_v55 = vld [vmem:[%s1730_s1 + $0x10] sm:$0xf] }
  0x13   : > { %v252_v6 = vsub.s32 %v249_v4, %v251_v5  ;;  %s1319_s25 = sshll.u32 %s1589_s24, 1  ;;  %vm885_vm8 = vcmask 490496   ;;  %v241_v63 = vld [vmem:[%s1730_s1 + $0x14] sm:$0xf]  ;;  %vm990_vm9 = vcmask 482304   ;;  %vm1095_vm10 = vcmask 474112  }
  0x14   : > { %s224_s28 = scalar_lea.vmem %s1729_s0, %s1319_s25  ;;  %s1320_s13 = sshll.u32 %s1589_s24, 3  ;;  %vm1217_vm11 = vcmask 130048  }
  0x15   : > { %v235_v8 = vld [vmem:[%s224_s28] sm:$0x3f]  ;;  %s233_s16 = scalar_lea.vmem %s1733_s4, %s1320_s13 }
  0x16   : > { %v253_v9 = vrot.slane %v235_v8, %v252_v6  ;;  %v246_v10 = vcombine.high %v235_v8, %v235_v8  ;;  %v242_v8 = vld [vmem:[%s1730_s1 + $0x18] sm:$0xf] }
  0x18   : > { %262 = vrot.lane.b32.xlu0 %v253_v9, %s1523_s29  ;;  %v260_v11 = vrot.slane %v246_v10, %v252_v6  ;;  %v261_v12 = vcombine.high %v253_v9, %v253_v9  ;;  %v370_v25 = vsel %vm275_vm1, %v253_v9, 0 }
  0x1a   : > { %266 = vrot.lane.b32.xlu1 %v260_v11, %s1523_s29  ;;  %v376_v22 = vsel %vm275_vm1, %v260_v11, 0 }
  0x1c   : > { %264 = vrot.lane.b32.xlu0 %v261_v12, %s1523_s29 }
  0x1e   : > { %459 = vrot.lane.b32.xlu1 %v253_v9, %s1524_s30 }
  0x20   : > { %461 = vrot.lane.b32.xlu0 %v261_v12, %s1524_s30 }
  0x22   : > { %463 = vrot.lane.b32.xlu1 %v260_v11, %s1524_s30 }
  0x24   : > { %564 = vrot.lane.b32.xlu0 %v253_v9, %s1525_s5 }
  0x26   : > { %566 = vrot.lane.b32.xlu1 %v261_v12, %s1525_s5 }
  0x28   : > { %568 = vrot.lane.b32.xlu0 %v260_v11, %s1525_s5 }
  0x2a   : > { %669 = vrot.lane.b32.xlu1 %v253_v9, %s1526_s6 }
  0x2c   : > { %671 = vrot.lane.b32.xlu0 %v261_v12, %s1526_s6 }
  0x2e   : > { %673 = vrot.lane.b32.xlu1 %v260_v11, %s1526_s6 }
  0x30   : > { %774 = vrot.lane.b32.xlu0 %v253_v9, %s1527_s7 }
  0x32   : > { %776 = vrot.lane.b32.xlu1 %v261_v12, %s1527_s7 }
  0x34   : > { %778 = vrot.lane.b32.xlu0 %v260_v11, %s1527_s7 }
  0x36   : > { %879 = vrot.lane.b32.xlu1 %v253_v9, %s1528_s8 }
  0x38   : > { %881 = vrot.lane.b32.xlu0 %v261_v12, %s1528_s8 }
  0x3a   : > { %883 = vrot.lane.b32.xlu1 %v260_v11, %s1528_s8 }
  0x3c   : > { %984 = vrot.lane.b32.xlu0 %v253_v9, %s1529_s9 }
  0x3e   : > { %986 = vrot.lane.b32.xlu1 %v261_v12, %s1529_s9 }
  0x40   : > { %988 = vrot.lane.b32.xlu0 %v260_v11, %s1529_s9 }
  0x42   : > { %1089 = vrot.lane.b32.xlu1 %v253_v9, %s1530_s10 }
  0x44   : > { %1091 = vrot.lane.b32.xlu0 %v261_v12, %s1530_s10 }
  0x46   : > { %1093 = vrot.lane.b32.xlu1 %v260_v11, %s1530_s10 }
  0x48   : > { %1197 = vperm.xlu0 %1476, %v1194_v13  }
  0x4a   : > { %1206 = vperm.xlu1 %1477, %v1203_v14  }
  0x8a   : > { %v263_v15 = vpop.permute.xlu0 %262 }
  0x8c   : > { %v267_v16 = vpop.permute.xlu1 %266 }
  0x8d   : > { %v283_v17 = vsel %vm275_vm1, %v267_v16, 0 }
  0x8e   : > { %v265_v18 = vpop.permute.xlu0 %264  ;;  %1369 = vmatpush3.bf16.msra.mxu1 %v283_v17 }
  0x8f   : > { %v270_v20 = vsel %vm268_vm2, %v265_v18, %v267_v16  ;;  %v269_v21 = vsel %vm268_vm2, %v263_v15, %v265_v18  ;;  %1374 = vmatprep.subr.bf16.mxu1 %v1520_v3  ;;  %v243_v15 = vld [vmem:[%s1730_s1 + $0x1c] sm:$0xf] }
  0x90   : > { %1321 = vmatprep.subr.msk.bf16.mxu0 %vm275_vm1, %v270_v20  ;;  %v277_v23 = vsel %vm275_vm1, %v269_v21, 0  ;;  %v460_v24 = vpop.permute.xlu1 %459 }
  0x91   : > { %300 = vmatpush1.bf16.msra.mxu0 %v277_v23  ;;  %1371 = vmatmul.mubr.msk.bf16.vlgmr.msra.gmra.mxu1 %vm271_vm3, %v237_v19 }
  0x92   : > { %1324 = vmatprep.subr.msk.bf16.mxu0 %vm275_vm1, %v261_v12  ;;  %v462_v26 = vpop.permute.xlu0 %461  ;;  %1375 = vmatpush3.bf16.msra.mxu1 %v376_v22 }
  0x93   : > { %1376 = vmatprep.mubr.msk.bf16.mxu1 %vm1521_vm0, %v1520_v3  ;;  %1380 = vmatprep.subr.bf16.mxu1 %v1520_v3  ;;  %v466_v31 = vsel %vm465_vm4, %v460_v24, %v462_v26 }
  0x94   : > { %1322 = vmatmul.mubr.msk.bf16.vlgmr.msra.gmra.mxu0 %vm271_vm3, %v237_v19  ;;  %v464_v27 = vpop.permute.xlu1 %463  ;;  %v472_v34 = vsel %vm275_vm1, %v466_v31, 0  ;;  %v244_v19 = vld [vmem:[%s1730_s1 + $0x20] sm:$0xf] }
  0x95   : > { %393 = vmatpush1.bf16.msra.mxu0 %v370_v25  ;;  %v467_v28 = vsel %vm465_vm4, %v462_v26, %v464_v27  ;;  %410 = vmatprep.mubr.bf16.mxu0 %v1522_v7  ;;  %v478_v32 = vsel %vm275_vm1, %v464_v27, 0 }
  0x96   : > { %1327 = vmatprep.subr.msk.bf16.mxu0 %vm275_vm1, %v467_v28  ;;  %v565_v30 = vpop.permute.xlu0 %564 }
  0x98   : > { %v567_v33 = vpop.permute.xlu1 %566 }
  0x99   : > { %1377 = vmatmul.mubr.msk.bf16.vlgmr.msra.gmra.mxu1 %vm271_vm3, %v236_v29  ;;  %v571_v40 = vsel %vm570_vm5, %v565_v30, %v567_v33 }
  0x9a   : > { %1381 = vmatpush3.bf16.msra.mxu1 %v478_v32  ;;  %1382 = vmatprep.mubr.msk.bf16.mxu1 %vm1521_vm0, %v1520_v3  ;;  %v569_v35 = vpop.permute.xlu0 %568  ;;  %v577_v43 = vsel %vm275_vm1, %v571_v40, 0 }
  0x9b   : > { %v572_v36 = vsel %vm570_vm5, %v567_v33, %v569_v35  ;;  %1386 = vmatprep.subr.bf16.mxu1 %v1520_v3  ;;  %v583_v41 = vsel %vm275_vm1, %v569_v35, 0 }
  0x9c   : > { %1325 = vmatmul.mubr.msk.bf16.vlgmr.msra.gmra.mxu0 %vm271_vm3, %v236_v29  ;;  %v670_v37 = vpop.permute.xlu1 %669 }
  0x9d   : > { %495 = vmatpush1.bf16.msra.mxu0 %v472_v34  ;;  %512 = vmatprep.mubr.bf16.mxu0 %v1522_v7 }
  0x9e   : > { %1330 = vmatprep.subr.msk.bf16.mxu0 %vm275_vm1, %v572_v36  ;;  %v672_v39 = vpop.permute.xlu0 %671 }
  0x9f   : > { %v676_v48 = vsel %vm675_vm6, %v670_v37, %v672_v39 }
  0xa0   : > { %v674_v42 = vpop.permute.xlu1 %673  ;;  %v682_v51 = vsel %vm275_vm1, %v676_v48, 0 }
  0xa1   : > { %1383 = vmatmul.mubr.msk.bf16.vlgmr.msra.gmra.mxu1 %vm271_vm3, %v238_v38  ;;  %v677_v45 = vsel %vm675_vm6, %v672_v39, %v674_v42  ;;  %v688_v49 = vsel %vm275_vm1, %v674_v42, 0 }
  0xa2   : > { %1387 = vmatpush3.bf16.msra.mxu1 %v583_v41  ;;  %1388 = vmatprep.mubr.msk.bf16.mxu1 %vm1521_vm0, %v1520_v3  ;;  %v775_v44 = vpop.permute.xlu0 %774 }
  0xa3   : > { %1392 = vmatprep.subr.bf16.mxu1 %v1520_v3 }
  0xa4   : > { %1328 = vmatmul.mubr.msk.bf16.vlgmr.msra.gmra.mxu0 %vm271_vm3, %v238_v38  ;;  %v777_v46 = vpop.permute.xlu1 %776 }
  0xa5   : > { %600 = vmatpush1.bf16.msra.mxu0 %v577_v43  ;;  %617 = vmatprep.mubr.bf16.mxu0 %v1522_v7  ;;  %v781_v56 = vsel %vm780_vm7, %v775_v44, %v777_v46 }
  0xa6   : > { %1333 = vmatprep.subr.msk.bf16.mxu0 %vm275_vm1, %v677_v45  ;;  %v779_v50 = vpop.permute.xlu0 %778  ;;  %v787_v59 = vsel %vm275_vm1, %v781_v56, 0 }
  0xa7   : > { %v782_v53 = vsel %vm780_vm7, %v777_v46, %v779_v50  ;;  %v793_v57 = vsel %vm275_vm1, %v779_v50, 0 }
  0xa8   : > { %v880_v52 = vpop.permute.xlu1 %879 }
  0xa9   : > { %1389 = vmatmul.mubr.msk.bf16.vlgmr.msra.gmra.mxu1 %vm271_vm3, %v239_v47 }
  0xaa   : > { %1393 = vmatpush3.bf16.msra.mxu1 %v688_v49  ;;  %1394 = vmatprep.mubr.msk.bf16.mxu1 %vm1521_vm0, %v1520_v3  ;;  %v882_v54 = vpop.permute.xlu0 %881 }
  0xab   : > { %1398 = vmatprep.subr.bf16.mxu1 %v1520_v3  ;;  %v886_v0 = vsel %vm885_vm8, %v880_v52, %v882_v54 }
  0xac   : > { %1331 = vmatmul.mubr.msk.bf16.vlgmr.msra.gmra.mxu0 %vm271_vm3, %v239_v47  ;;  %v884_v58 = vpop.permute.xlu1 %883  ;;  %v892_v4 = vsel %vm275_vm1, %v886_v0, 0 }
  0xad   : > { %705 = vmatpush1.bf16.msra.mxu0 %v682_v51  ;;  %722 = vmatprep.mubr.bf16.mxu0 %v1522_v7  ;;  %v887_v61 = vsel %vm885_vm8, %v882_v54, %v884_v58  ;;  %v898_v1 = vsel %vm275_vm1, %v884_v58, 0 }
  0xae   : > { %1336 = vmatprep.subr.msk.bf16.mxu0 %vm275_vm1, %v782_v53  ;;  %v985_v60 = vpop.permute.xlu0 %984 }
  0xb0   : > { %v987_v62 = vpop.permute.xlu1 %986 }
  0xb1   : > { %1395 = vmatmul.mubr.msk.bf16.vlgmr.msra.gmra.mxu1 %vm271_vm3, %v240_v55  ;;  %v991_v9 = vsel %vm990_vm9, %v985_v60, %v987_v62 }
  0xb2   : > { %1399 = vmatpush3.bf16.msra.mxu1 %v793_v57  ;;  %1400 = vmatprep.mubr.msk.bf16.mxu1 %vm1521_vm0, %v1520_v3  ;;  %v989_v2 = vpop.permute.xlu0 %988  ;;  %v997_v13 = vsel %vm275_vm1, %v991_v9, 0 }
  0xb3   : > { %1404 = vmatprep.subr.bf16.mxu1 %v1520_v3  ;;  %v992_v6 = vsel %vm990_vm9, %v987_v62, %v989_v2  ;;  %v1003_v10 = vsel %vm275_vm1, %v989_v2, 0 }
  0xb4   : > { %1334 = vmatmul.mubr.msk.bf16.vlgmr.msra.gmra.mxu0 %vm271_vm3, %v240_v55  ;;  %v1090_v5 = vpop.permute.xlu1 %1089 }
  0xb5   : > { %810 = vmatpush1.bf16.msra.mxu0 %v787_v59  ;;  %827 = vmatprep.mubr.bf16.mxu0 %v1522_v7 }
  0xb6   : > { %1339 = vmatprep.subr.msk.bf16.mxu0 %vm275_vm1, %v887_v61  ;;  %v1092_v11 = vpop.permute.xlu0 %1091 }
  0xb7   : > { %v1096_v16 = vsel %vm1095_vm10, %v1090_v5, %v1092_v11 }
  0xb8   : > { %v1094_v12 = vpop.permute.xlu1 %1093  ;;  %v1102_v18 = vsel %vm275_vm1, %v1096_v16, 0 }
  0xb9   : > { %1401 = vmatmul.mubr.msk.bf16.vlgmr.msra.gmra.mxu1 %vm271_vm3, %v241_v63  ;;  %v1097_v14 = vsel %vm1095_vm10, %v1092_v11, %v1094_v12  ;;  %v1108_v17 = vsel %vm275_vm1, %v1094_v12, 0 }
  0xba   : > { %1405 = vmatpush3.bf16.msra.mxu1 %v898_v1  ;;  %1406 = vmatprep.mubr.msk.bf16.mxu1 %vm1521_vm0, %v1520_v3 }
  0xbb   : > { %1410 = vmatprep.subr.bf16.mxu1 %v1520_v3 }
  0xbc   : > { %1337 = vmatmul.mubr.msk.bf16.vlgmr.msra.gmra.mxu0 %vm271_vm3, %v241_v63 }
  0xbd   : > { %915 = vmatpush1.bf16.msra.mxu0 %v892_v4  ;;  %932 = vmatprep.mubr.bf16.mxu0 %v1522_v7 }
  0xbe   : > { %1342 = vmatprep.subr.msk.bf16.mxu0 %vm275_vm1, %v992_v6 }
  0xc1   : > { %1407 = vmatmul.mubr.msk.bf16.vlgmr.msra.gmra.mxu1 %vm271_vm3, %v242_v8 }
  0xc2   : > { %1411 = vmatpush3.bf16.msra.mxu1 %v1003_v10  ;;  %1412 = vmatprep.mubr.msk.bf16.mxu1 %vm1521_vm0, %v1520_v3 }
  0xc3   : > { %1416 = vmatprep.subr.bf16.mxu1 %v1520_v3 }
  0xc4   : > { %1340 = vmatmul.mubr.msk.bf16.vlgmr.msra.gmra.mxu0 %vm271_vm3, %v242_v8 }
  0xc5   : > { %1020 = vmatpush1.bf16.msra.mxu0 %v997_v13  ;;  %1037 = vmatprep.mubr.bf16.mxu0 %v1522_v7 }
  0xc6   : > { %1345 = vmatprep.subr.msk.bf16.mxu0 %vm275_vm1, %v1097_v14 }
  0xc9   : > { %1413 = vmatmul.mubr.msk.bf16.vlgmr.msra.gmra.mxu1 %vm271_vm3, %v243_v15 }
  0xca   : > { %1417 = vmatpush3.bf16.msra.mxu1 %v1108_v17  ;;  %1418 = vmatprep.mubr.msk.bf16.mxu1 %vm1521_vm0, %v1520_v3 }
  0xcc   : > { %1343 = vmatmul.mubr.msk.bf16.vlgmr.msra.gmra.mxu0 %vm271_vm3, %v243_v15 }
  0xcd   : > { %1125 = vmatpush1.bf16.msra.mxu0 %v1102_v18  ;;  %1142 = vmatprep.mubr.bf16.mxu0 %v1522_v7 }
  0xd1   : > { %1419 = vmatmul.mubr.msk.bf16.vlgmr.msra.gmra.mxu1 %vm271_vm3, %v244_v19 }
  0xd4   : > { %1346 = vmatmul.mubr.msk.bf16.vlgmr.msra.gmra.mxu0 %vm271_vm3, %v244_v19 }
 0x151   : > { %v360_v20 = vpop.f32.mrf.mxu1 }
 0x153   : > { %v1372_v21 = vpop.f32.mrf.mxu1 }
 0x154   : > { %v319_v22 = vpop.f32.mrf.mxu0 }
 0x155   : > { %v363_v23 = vpop.f32.mrf.mxu1 }
 0x156   : > { %v321_v24 = vpop.f32.mrf.mxu0 }
 0x157   : > { %v1373_v25 = vpop.f32.mrf.mxu1 }
 0x158   : > { %v323_v3 = vpop.f32.mrf.mxu0 }
 0x159   : > { %v453_v26 = vpop.f32.mrf.mxu1 }
 0x15a   : > { %v324_v27 = vpop.f32.mrf.mxu0  ;;  %v454_v5 = vadd.f32 %v453_v26, %v360_v20 }
 0x15b   : > { %v1378_v28 = vpop.f32.mrf.mxu1 }
 0x15c   : > { %v412_v29 = vpop.f32.mrf.mxu0 }
 0x15d   : > { %v456_v7 = vpop.f32.mrf.mxu1  ;;  %v413_v11 = vadd.f32 %v412_v29, %v319_v22 }
 0x15e   : > { %v414_v30 = vpop.f32.mrf.mxu0 }
 0x15f   : > { %v1379_v31 = vpop.f32.mrf.mxu1  ;;  %v415_v15 = vadd.f32 %v414_v30, %v321_v24 }
 0x160   : > { %v416_v32 = vpop.f32.mrf.mxu0 }
 0x161   : > { %v555_v33 = vpop.f32.mrf.mxu1 }
 0x162   : > { %v417_v34 = vpop.f32.mrf.mxu0  ;;  %v563_v9 = vadd.f32 %v555_v33, %v454_v5 }
 0x163   : > { %v1384_v35 = vpop.f32.mrf.mxu1 }
 0x164   : > { %v514_v36 = vpop.f32.mrf.mxu0 }
 0x165   : > { %v558_v37 = vpop.f32.mrf.mxu1  ;;  %v561_v16 = vadd.f32 %v514_v36, %v413_v11  ;;  %v1198_v36 = vpop.permute.xlu0 %1197 }
 0x166   : > { %v516_v38 = vpop.f32.mrf.mxu0 }
 0x167   : > { %v1385_v39 = vpop.f32.mrf.mxu1  ;;  %v562_v21 = vadd.f32 %v516_v38, %v415_v15 }
 0x168   : > { %v518_v40 = vpop.f32.mrf.mxu0 }
 0x169   : > { %v660_v41 = vpop.f32.mrf.mxu1 }
 0x16a   : > { %v519_v42 = vpop.f32.mrf.mxu0  ;;  %v668_v13 = vadd.f32 %v660_v41, %v563_v9 }
 0x16b   : > { %v1390_v43 = vpop.f32.mrf.mxu1  ;;  %v1207_v42 = vpop.permute.xlu1 %1206 }
 0x16c   : > { %v619_v44 = vpop.f32.mrf.mxu0 }
 0x16d   : > { %v663_v45 = vpop.f32.mrf.mxu1  ;;  %v666_v23 = vadd.f32 %v619_v44, %v561_v16 }
 0x16e   : > { %v621_v46 = vpop.f32.mrf.mxu0 }
 0x16f   : > { %v1391_v47 = vpop.f32.mrf.mxu1  ;;  %v667_v28 = vadd.f32 %v621_v46, %v562_v21 }
 0x170   : > { %v623_v48 = vpop.f32.mrf.mxu0 }
 0x171   : > { %v765_v49 = vpop.f32.mrf.mxu1 }
 0x172   : > { %v624_v50 = vpop.f32.mrf.mxu0  ;;  %v773_v18 = vadd.f32 %v765_v49, %v668_v13 }
 0x173   : > { %v1396_v51 = vpop.f32.mrf.mxu1 }
 0x174   : > { %v724_v52 = vpop.f32.mrf.mxu0 }
 0x175   : > { %v768_v53 = vpop.f32.mrf.mxu1  ;;  %v771_v20 = vadd.f32 %v724_v52, %v666_v23 }
 0x176   : > { %v726_v54 = vpop.f32.mrf.mxu0 }
 0x177   : > { %v1397_v55 = vpop.f32.mrf.mxu1  ;;  %v772_v32 = vadd.f32 %v726_v54, %v667_v28 }
 0x178   : > { %v728_v56 = vpop.f32.mrf.mxu0 }
 0x179   : > { %v870_v57 = vpop.f32.mrf.mxu1 }
 0x17a   : > { %v729_v58 = vpop.f32.mrf.mxu0  ;;  %v878_v3 = vadd.f32 %v870_v57, %v773_v18 }
 0x17b   : > { %v1402_v59 = vpop.f32.mrf.mxu1 }
 0x17c   : > { %v829_v60 = vpop.f32.mrf.mxu0 }
 0x17d   : > { %v873_v61 = vpop.f32.mrf.mxu1  ;;  %v876_v22 = vadd.f32 %v829_v60, %v771_v20 }
 0x17e   : > { %v831_v62 = vpop.f32.mrf.mxu0 }
 0x17f   : > { %v1403_v63 = vpop.f32.mrf.mxu1  ;;  %v877_v30 = vadd.f32 %v831_v62, %v772_v32 }
 0x180   : > { %v833_v0 = vpop.f32.mrf.mxu0 }
 0x181   : > { %v975_v1 = vpop.f32.mrf.mxu1 }
 0x182   : > { %v834_v2 = vpop.f32.mrf.mxu0  ;;  %v983_v7 = vadd.f32 %v975_v1, %v878_v3 }
 0x183   : > { %v1408_v4 = vpop.f32.mrf.mxu1 }
 0x184   : > { %v934_v6 = vpop.f32.mrf.mxu0 }
 0x185   : > { %v978_v8 = vpop.f32.mrf.mxu1  ;;  %v981_v34 = vadd.f32 %v934_v6, %v876_v22 }
 0x186   : > { %v936_v10 = vpop.f32.mrf.mxu0 }
 0x187   : > { %v1409_v12 = vpop.f32.mrf.mxu1  ;;  %v982_v39 = vadd.f32 %v936_v10, %v877_v30 }
 0x188   : > { %v938_v14 = vpop.f32.mrf.mxu0 }
 0x189   : > { %v1080_v17 = vpop.f32.mrf.mxu1 }
 0x18a   : > { %v939_v19 = vpop.f32.mrf.mxu0  ;;  %v1088_v33 = vadd.f32 %v1080_v17, %v983_v7 }
 0x18b   : > { %v1414_v25 = vpop.f32.mrf.mxu1 }
 0x18c   : > { %v1039_v27 = vpop.f32.mrf.mxu0 }
 0x18d   : > { %v1083_v26 = vpop.f32.mrf.mxu1  ;;  %v1086_v40 = vadd.f32 %v1039_v27, %v981_v34 }
 0x18e   : > { %v1041_v31 = vpop.f32.mrf.mxu0 }
 0x18f   : > { %v1415_v29 = vpop.f32.mrf.mxu1  ;;  %v1087_v45 = vadd.f32 %v1041_v31, %v982_v39 }
 0x190   : > { %v1043_v24 = vpop.f32.mrf.mxu0 }
 0x191   : > { %v1185_v35 = vpop.f32.mrf.mxu1 }
 0x192   : > { %v1193_v37 = vadd.f32 %v1185_v35, %v1088_v33  ;;  %v1044_v38 = vpop.f32.mrf.mxu0 }
 0x193   : > { %v1420_v41 = vpop.f32.mrf.mxu1 }
 0x194   : > { %v1202_v43 = vmul.f32 %v1198_v36, %v1193_v37  ;;  %v1144_v44 = vpop.f32.mrf.mxu0 }
 0x195   : > { %v1191_v46 = vadd.f32 %v1144_v44, %v1086_v40  ;;  %v1188_v47 = vpop.f32.mrf.mxu1 }
 0x196   : > { %v1211_v48 = vadd.f32 %v1207_v42, %v1202_v43  ;;  %v1146_v49 = vpop.f32.mrf.mxu0 }
 0x197   : > { %v1200_v50 = vmul.f32 %v1198_v36, %v1191_v46  ;;  %v1192_v51 = vadd.f32 %v1146_v49, %v1087_v45  ;;  %v1421_v52 = vpop.f32.mrf.mxu1 }
 0x198   : > { %v1214_v53 = vmax.f32 %v1211_v48, 0.0  ;;  %v1148_v54 = vpop.f32.mrf.mxu0 }
 0x199   : > { %v1209_v55 = vadd.f32 %v1207_v42, %v1200_v50  ;;  %v1201_v56 = vmul.f32 %v1198_v36, %v1192_v51 }
 0x19a   : > { %1218 = vst.msk [vmem:[%s233_s16 + $0x10] sm:$0xff] %vm1217_vm11, %v1214_v53  ;;  %v1149_v57 = vpop.f32.mrf.mxu0 }
 0x19b   : > { %v1212_v58 = vmax.f32 %v1209_v55, 0.0  ;;  %v1210_v59 = vadd.f32 %v1207_v42, %v1201_v56 }
 0x19d   : > { %1215 = vst [vmem:[%s233_s16] sm:$0xff] %v1212_v58  ;;  %v1213_v60 = vmax.f32 %v1210_v59, 0.0 }
 0x19f   : > { %1216 = vst [vmem:[%s233_s16 + $0x8] sm:$0xff] %v1213_v60 }
 0x1a0 PF: > { %s14_s19 = sadd.s32 1, %s1517_s19   ;;  %s1734_s15 = smov %s1509_s17 }
 0x1a1   : > { %p11_p7 = scmp.ge.s32.totalorder %s14_s19, 10   ;;  %s1735_s16 = smov %s1513_s18 }
 0x1a2   : > { %s1736_s17 = smov %s1739_s20  ;;  %s1737_s18 = smov %s1743_s21 }
 0x1a3   :  { %13 = sbr.rel (!%p11_p7) target bundleno = 3 (0x3), region = 66 }

</bundles_post_ra>
